<compile_context>
chip_gen: v6e
topology: v6e:2x2x1
jax: 0.10.0
libtpu: 0.0.40
codegen_flags: <defaults>
</compile_context>

<pallas_src>
import jax
import jax.numpy as jnp
from jax import lax
from jax.experimental import pallas as pl
from jax.experimental.pallas import tpu as pltpu


_WAVE = 8  # row DMAs per wave in the HBM gather path (two waves kept in flight)


def _round_up(x, m):
    return ((x + m - 1) // m) * m


def _vmem_capacity_bytes():
    """Physical VMEM of the current generation (v5e/v6e: 128 MiB, v7x: 64 MiB)."""
    try:
        return int(pltpu.get_tpu_info().vmem_capacity_bytes)
    except Exception:
        return 64 * 1024 * 1024  # conservative fallback (v7x per-core VMEM)


def _pick_tok_tile(N, max_tile):
    """Pick a token-tile size.

    Multiple of _WAVE, capped by the generation/VMEM budget, prefers a divisor
    of N (avoids id padding + the out[:N] copy) and leaves >= 2 grid tiles when
    there is enough work so both v7x TensorCores get tiles.
    """
    n_ceil = _round_up(N, _WAVE)
    t = max(_WAVE, (min(max_tile, n_ceil) // _WAVE) * _WAVE)
    if n_ceil >= 2 * _WAVE:
        t = min(t, _round_up(-(-N // 2), _WAVE))
    for cand in range(t, max(_WAVE, t // 2) - 1, -_WAVE):
        if N % cand == 0:
            return cand
    return t


def prepare_embedding_table(W_E):
    """One-time parameter prep: (d_model, d_vocab) -> (d_vocab, d_model).

    Do this once when parameters are created/loaded, NOT per forward — a
    per-call transpose reads+writes the entire table in HBM and dominated the
    previous version's wall time.
    """
    return jnp.transpose(W_E)


# ---------------------------------------------------------------------------
# Path 1: small table, VMEM-resident, one-hot x MXU gather
# ---------------------------------------------------------------------------

def _embed_small_table_kernel(ids_ref, w_ref, out_ref):
    """Gather one token tile from a VMEM-resident table via one-hot x MXU.

    ids_ref: (tok_tile, 1) int32 VMEM block
    w_ref:   (d_vocab, d_model) full table, stays resident across all tiles
    out_ref: (tok_tile, d_model) output block
    """
    ids = ids_ref[...]                                         # (tok_tile, 1)
    tok_tile = ids.shape[0]
    d_vocab = w_ref.shape[0]
    vocab_iota = lax.broadcasted_iota(jnp.int32, (tok_tile, d_vocab), 1)
    onehot = (ids == vocab_iota).astype(w_ref.dtype)           # (tok_tile, d_vocab)
    out_ref[...] = jnp.dot(
        onehot, w_ref[...], preferred_element_type=jnp.float32
    ).astype(out_ref.dtype)
    # TODO(synk): for mid-size vocabs a dynamic-row-slice gather from the VMEM
    # table would avoid the one-hot MXU flops; one-hot is used here per review
    # guidance for very small d_model / d_vocab.


def _embed_small_table(ids, w_vd, tok_tile, vmem_cap):
    N = ids.shape[0]
    d_vocab, d_model = w_vd.shape
    itemsize = jnp.dtype(w_vd.dtype).itemsize

    if tok_tile is None:
        # keep the (tok_tile, d_vocab) one-hot temporary <= ~4 MiB
        max_tile = min(1024, max(_WAVE, (4 * 2**20) // (4 * d_vocab)))
        tok_tile = _pick_tok_tile(N, max_tile)
    else:
        tok_tile = max(_WAVE, (tok_tile // _WAVE) * _WAVE)

    n_tiles = -(-N // tok_tile)
    N_pad = n_tiles * tok_tile
    if N_pad != N:
        ids = jnp.pad(ids, (0, N_pad - N))      # pad with token 0 (valid row)
    ids2d = ids.reshape(N_pad, 1)

    table_bytes = d_vocab * d_model * itemsize
    needed = (table_bytes
              + 2 * tok_tile * 4                      # ids blocks (double-buffered)
              + 2 * tok_tile * d_model * itemsize     # output blocks
              + 4 * tok_tile * d_vocab)               # one-hot temporary
    vmem_limit = int(min(vmem_cap // 2, max(32 * 2**20, 2 * needed)))

    out = pl.pallas_call(
        _embed_small_table_kernel,
        out_shape=jax.ShapeDtypeStruct((N_pad, d_model), w_vd.dtype),
        grid=(n_tiles,),
        in_specs=[
            pl.BlockSpec((tok_tile, 1), lambda i: (i, 0)),
            # same block every step -> the table stays resident, no re-DMA
            pl.BlockSpec((d_vocab, d_model), lambda i: (0, 0)),
        ],
        out_specs=pl.BlockSpec((tok_tile, d_model), lambda i: (i, 0)),
        compiler_params=pltpu.CompilerParams(
            dimension_semantics=("parallel",),
            vmem_limit_bytes=vmem_limit,
        ),
    )(ids2d, w_vd)

    return out if N_pad == N else out[:N]


# ---------------------------------------------------------------------------
# Path 2: large table, HBM-resident, true row gather via DMA
# ---------------------------------------------------------------------------

def _embed_hbm_gather_kernel(ids_smem, w_hbm, out_ref, sems):
    """Row-gather one tile of tokens via HBM->VMEM row DMAs.

    ids_smem: (N_pad,) int32 token ids resident in SMEM.
    w_hbm:    (d_vocab, d_model) table left in HBM (pl.ANY); only the
              requested rows are moved (N*d_model*itemsize bytes, not the table).
    out_ref:  (tok_tile, d_model) auto-pipelined VMEM output block; row DMAs
              land directly in it, and every copy is waited on before the grid
              step ends (required for the pipelined writeback to be safe).
    sems:     (2, _WAVE) DMA semaphores — a fixed 16-semaphore ring; two waves
              of _WAVE row copies are in flight so DMA issue overlaps completion.
    """
    tok_tile, _ = out_ref.shape
    nwaves = tok_tile // _WAVE                    # static (tok_tile % _WAVE == 0)
    tile_base = pl.multiple_of(pl.program_id(0) * tok_tile, _WAVE)

    def issue_wave(w, slot):
        base = w * _WAVE
        for j in range(_WAVE):                    # short static unroll
            row = ids_smem[tile_base + base + j]  # scalar read from SMEM
            pltpu.make_async_copy(
                w_hbm.at[pl.ds(row, 1), :],        # one (1, d_model) row in HBM
                out_ref.at[pl.ds(base + j, 1), :],  # its slot in the output tile
                sems.at[slot, j],
            ).start()

    def wait_wave(w, slot):
        base = w * _WAVE
        for j in range(_WAVE):
            # The wait only needs the destination shape + semaphore; the source
            # slice here is a same-shaped dummy.
            pltpu.make_async_copy(
                w_hbm.at[pl.ds(0, 1), :],
                out_ref.at[pl.ds(base + j, 1), :],
                sems.at[slot, j],
            ).wait()

    # Software-pipeline the waves: wave w+1 is issued before waiting on wave w,
    # so up to 2*_WAVE row DMAs are always in flight.
    issue_wave(0, 0)

    def body(w, carry):
        slot = w % 2
        issue_wave(w + 1, 1 - slot)
        wait_wave(w, slot)
        return carry

    lax.fori_loop(0, nwaves - 1, body, 0)
    wait_wave(nwaves - 1, (nwaves - 1) % 2)
    # TODO(synk): a manual cross-tile double buffer (output in pl.ANY + explicit
    # writeback DMA) would additionally overlap tile i+1's row gather with tile
    # i's wait/writeback; direct HBM->HBM row copies are another option.


def _embed_hbm_gather(ids, w_vd, tok_tile, vmem_cap):
    N = ids.shape[0]
    d_vocab, d_model = w_vd.shape
    itemsize = jnp.dtype(w_vd.dtype).itemsize

    if tok_tile is None:
        budget = min(vmem_cap // 4, 16 * 2**20)   # double-buffered out-block budget
        max_tile = min(512, max(_WAVE, budget // (2 * d_model * itemsize)))
        tok_tile = _pick_tok_tile(N, max_tile)
    else:
        tok_tile = max(_WAVE, (tok_tile // _WAVE) * _WAVE)

    n_tiles = -(-N // tok_tile)
    N_pad = n_tiles * tok_tile
    if N_pad != N:
        ids = jnp.pad(ids, (0, N_pad - N))        # pad with token 0 (valid row)

    needed = 2 * tok_tile * d_model * itemsize
    vmem_limit = int(min(vmem_cap // 2, max(32 * 2**20, 4 * needed)))

    out = pl.pallas_call(
        _embed_hbm_gather_kernel,
        out_shape=jax.ShapeDtypeStruct((N_pad, d_model), w_vd.dtype),
        grid=(n_tiles,),
        in_specs=[
            # Token ids resident in SMEM; they never appear in an index_map so
            # no scalar prefetch is needed.
            # TODO(synk): for very large N (>~100K tokens) switch to a blocked
            # SMEM BlockSpec ((1, tok_tile), lambda i: (i, 0)) to bound SMEM use.
            pl.BlockSpec(memory_space=pltpu.MemorySpace.SMEM),
            # The table never enters VMEM wholesale; rows are DMA'd on demand.
            pl.BlockSpec(memory_space=pl.ANY),
        ],
        out_specs=pl.BlockSpec((tok_tile, d_model), lambda i: (i, 0)),
        scratch_shapes=[pltpu.SemaphoreType.DMA((2, _WAVE))],
        compiler_params=pltpu.CompilerParams(
            dimension_semantics=("parallel",),     # v7x: tiles over both TCs
            vmem_limit_bytes=vmem_limit,
        ),
    )(ids, w_vd)

    return out if N_pad == N else out[:N]


# ---------------------------------------------------------------------------
# Public forward
# ---------------------------------------------------------------------------

def embed_forward(x, w_vd, *, tok_tile=None, force_hbm_gather=False):
    """Embedding forward.

    x:    (batch, pos) integer token ids.
    w_vd: (d_vocab, d_model) table — the module's W_E transposed ONCE via
          prepare_embedding_table (never per call).

    Returns (batch, pos, d_model) == torch.einsum('dbp -> bpd', W_E[:, x]).
    """
    B, P = x.shape
    d_vocab, d_model = w_vd.shape
    N = B * P
    itemsize = jnp.dtype(w_vd.dtype).itemsize
    vmem_cap = _vmem_capacity_bytes()

    # PyTorch advanced indexing raises on out-of-range ids; clamping instead
    # keeps an invalid id from hard-faulting the DMA engine.
    ids = jnp.clip(x.reshape(N).astype(jnp.int32), 0, d_vocab - 1)

    table_bytes = d_vocab * d_model * itemsize
    small_table = (not force_hbm_gather
                   and d_vocab <= 4096
                   and table_bytes <= vmem_cap // 8)

    if small_table:
        out = _embed_small_table(ids, w_vd, tok_tile, vmem_cap)
    else:
        out = _embed_hbm_gather(ids, w_vd, tok_tile, vmem_cap)
    return out.reshape(B, P, d_model)


if __name__ == "__main__":
    d_vocab, d_model = 64, 32
    batch, pos = 2, 8

    key = jax.random.PRNGKey(0)
    k_w, k_x = jax.random.split(key)

    # Same init as the PyTorch module: randn(d_model, d_vocab) / sqrt(d_model)
    W_E = jax.random.normal(k_w, (d_model, d_vocab), dtype=jnp.float32) / jnp.sqrt(
        jnp.float32(d_model)
    )
    x = jax.random.randint(k_x, (batch, pos), 0, d_vocab, dtype=jnp.int32)

    # One-time parameter prep: the transpose happens here, NOT per forward.
    W_VD = prepare_embedding_table(W_E)

    # Pure-JAX reference: einsum('dbp -> bpd', W_E[:, x]) == W_E.T[x]
    ref = jnp.take(W_VD, x.reshape(-1), axis=0).reshape(batch, pos, d_model)

    # 1) Small-table VMEM fast path (the path this shape actually takes).
    out_fast = jax.block_until_ready(embed_forward(x, W_VD))
    assert out_fast.shape == (batch, pos, d_model), out_fast.shape
    assert out_fast.dtype == W_E.dtype, out_fast.dtype
    assert jnp.allclose(out_fast, ref, atol=1e-6, rtol=1e-6), "small-table path mismatch"

    # 2) Large-table HBM row-gather path, forced on the same inputs (bit-exact).
    out_gather = jax.block_until_ready(embed_forward(x, W_VD, force_hbm_gather=True))
    assert jnp.allclose(out_gather, ref, atol=0.0, rtol=0.0), "gather path mismatch"

    # 3) Ragged token count (exercises tile selection, padding and the tail slice).
    x2 = jax.random.randint(key, (3, 5), 0, d_vocab, dtype=jnp.int32)
    ref2 = jnp.take(W_VD, x2.reshape(-1), axis=0).reshape(3, 5, d_model)
    out2 = jax.block_until_ready(embed_forward(x2, W_VD))
    assert jnp.allclose(out2, ref2, atol=1e-6, rtol=1e-6), "ragged case mismatch"

    print("KERNEL_OK")
</pallas_src>

<mosaic_0001>
module attributes {stable_mosaic.version = 11 : i64} {
  func.func @_embed_small_table_kernel(%arg0: i32, %arg1: memref<8x1xi32, #tpu.memory_space<vmem>>, %arg2: memref<64x32xf32, #tpu.memory_space<vmem>>, %arg3: memref<8x32xf32, #tpu.memory_space<vmem>>) attributes {dimension_semantics = [#tpu.dimension_semantics<parallel>], iteration_bounds = array<i64: 2>, scalar_prefetch = 0 : i64, scratch_operands = 0 : i64, tpu.core_type = #tpu.core_type<tc>, window_params = [{transform_indices = @transform_0, window_bounds = array<i64: 8, 1>}, {pipeline_mode = #tpu.pipeline_mode<synchronous>, transform_indices = @transform_1, window_bounds = array<i64: 64, 32>}, {transform_indices = @transform_2, window_bounds = array<i64: 8, 32>}]} {
    %c0 = arith.constant 0 : index
    %c0_0 = arith.constant 0 : index
    %0 = vector.load %arg1[%c0, %c0_0] : memref<8x1xi32, #tpu.memory_space<vmem>>, vector<8x1xi32>
    %1 = tpu.iota {dimensions = array<i32: 1>} : vector<8x64xi32>
    %2 = vector.broadcast %0 : vector<8x1xi32> to vector<8x64xi32>
    %3 = arith.cmpi eq, %2, %1 : vector<8x64xi32>
    %4 = arith.extui %3 : vector<8x64xi1> to vector<8x64xi32>
    %5 = arith.sitofp %4 : vector<8x64xi32> to vector<8x64xf32>
    %c0_1 = arith.constant 0 : index
    %c0_2 = arith.constant 0 : index
    %6 = vector.load %arg2[%c0_1, %c0_2] : memref<64x32xf32, #tpu.memory_space<vmem>>, vector<64x32xf32>
    %cst = arith.constant dense<0.000000e+00> : vector<8x32xf32>
    %7 = tpu.matmul %5, %6, %cst {dimension_numbers = #tpu.dot_dimension_numbers<[1], [0], [0], [1], [0, 0, 1, 1], [], []>} : vector<8x64xf32>, vector<64x32xf32>, vector<8x32xf32> -> vector<8x32xf32>
    %c0_3 = arith.constant 0 : index
    %c0_4 = arith.constant 0 : index
    %8 = vector.load %arg3[%c0_3, %c0_4] : memref<8x32xf32, #tpu.memory_space<vmem>>, vector<8x32xf32>
    tpu.vector_store %arg3[%c0_3, %c0_4], %7 {strides = array<i32>} : memref<8x32xf32, #tpu.memory_space<vmem>>, vector<8x32xf32>,
    return
  }
  func.func @transform_0(%arg0: i32) -> (i32, i32) {
    %c0_i32 = arith.constant 0 : i32
    %c0_i32_0 = arith.constant 0 : i32
    return %arg0, %c0_i32 : i32, i32
  }
  func.func @transform_1(%arg0: i32) -> (i32, i32) {
    %c0_i32 = arith.constant 0 : i32
    %c0_i32_0 = arith.constant 0 : i32
    %c0_i32_1 = arith.constant 0 : i32
    return %c0_i32, %c0_i32_0 : i32, i32
  }
  func.func @transform_2(%arg0: i32) -> (i32, i32) {
    %c0_i32 = arith.constant 0 : i32
    %c0_i32_0 = arith.constant 0 : i32
    return %arg0, %c0_i32 : i32, i32
  }
}

</mosaic_0001>

<bundles_post_ra>
// kernel: tpu_custom_call.1
= control target key start
LH: loop header
LB: loop body
LE: loop exit
PB: predicated region body
PF: predicated region fallthrough
CT: control target
= control target key end

     0   :  { %7 = vsyncpa [#allocation3], 0  ;;  %s592_s0 = inlined_call_operand.vmem [shape: s32[16,1], index: 0, kind: input, shape index: {}]   ;;  %s593_s1 = inlined_call_operand.vmem [shape: f32[64,32], index: 1, kind: input, shape index: {}]   ;;  %s594_s2 = inlined_call_operand.hbm [shape: f32[16,32], index: 2, kind: output, shape index: {}]  }
   0x1   :  { %9 = vsyncpa [#allocation3 + $0x1], 0  ;;  %s469_s9 = smov 0   ;;  %s471_s10 = smov 0  }
   0x2   :  { %s473_s11 = smov 0   ;;  %s475_s12 = smov 0  }
   0x3 LB: > { %s490_s13 = sadd.s32 4294967295, %s448_s12   ;;  %s305_s14 = sadd.s32 4294967294, %s448_s12   ;;  %s448_s12 = sphi %s475_s12, %s600_s12   ;;  %s444_s11 = sphi %s473_s11, %s599_s11   ;;  %s440_s10 = sphi %s471_s10, %s598_s10   ;;  %s436_s9 = sphi %s469_s9, %s597_s9  }
   0x4   : > { %s494_s15 = sadd.s32 1, %s448_s12   ;;  %s69_s16 = sadd.s32 1, %s444_s11 }
   0x5   : > { %s66_s17 = ssub.s32 %s448_s12, %s494_s15  ;;  %p79_p0 = scmp.ne.s32.totalorder %s444_s11, %s440_s10 }
   0x6   : > { %p67_p1 = scmp.eq.s32.totalorder %s66_s17, 0  ;;  %p80_p2 = scmp.eq.s32.totalorder %s490_s13, 1 }
   0x7   : > { %p85_p3 = scmp.ne.s32.totalorder %s440_s10, %s436_s9  ;;  %p86_p4 = scmp.eq.s32.totalorder %s305_s14, 1 }
   0x8   : > { %s505_s18 = scalar_select %p67_p1, %s444_s11, %s69_s16  }
   0x9   : > { %p507_p5 = por %p80_p2, %p79_p0  ;;  %p511_p6 = por %p86_p4, %p85_p3 }
   0xa   : > { %p308_p7 = scmp.ge.s32.totalorder %s448_s12, 1  ;;  %p114_p8 = scmp.lt.s32.totalorder %s448_s12, 3 }
   0xc   : > { %p115_p9 = pnand %p308_p7, %p114_p8 }
   0xd   : > { %p135_p10 = scmp.lt.s32.totalorder (!%p115_p9), %s490_s13, 1  ;;  %s132_s23 = sand.u32 (!%p115_p9), 1, %s440_s10  }
   0xe   : > { %118 = sbr.rel (%p115_p9) target bundleno = 357 (0x165), region = 28  ;;  %s309_s24 = sshll.u32 (!%p115_p9), %s132_s23, 3 }
   0xf   : > { %s134_s26 = scalar_lea.vmem (!%p115_p9), [#allocation2], %s309_s24 }
  0x10   : > { %s246_s27 = sshll.u32 (!%p115_p9), %s134_s26, 4  ;;  %s553_s27 = int_to_ptr.vmem [resolvable:$true] %s246_s27 }
  0x11   : > { %s388_s4 = scalar_lea.vmem (!%p115_p9), %s553_s27, 128 }
  0x12   : > { %p389_p11 = scmp.ne.s32.totalorder (!%p115_p9), %s553_s27, %s388_s4 }
  0x13   : > { %v155_v0 = vld [vmem:[%s593_s1 + $0x38] sm:$0xff]  ;;  %v450_v1 = vmov 0   ;;  %v451_v2 = vmov 0.0   ;;  %v154_v3 = vld [vmem:[%s593_s1 + $0x30] sm:$0xff]  ;;  %s136_s25 = scalar_select %p135_p10, %s490_s13, 1  ;;  %v153_v4 = vld [vmem:[%s593_s1 + $0x28] sm:$0xff]  ;;  %v140_v11 = vlaneseq }
  0x14   : > { %387 = vset.pattern.permute.xlu0 %v450_v1  ;;  %326 = vmatprep.subr.mxu0 %v451_v2  ;;  %vm452_vm0 = vmmov 0   ;;  %v152_v5 = vld [vmem:[%s593_s1 + $0x20] sm:$0xff]  ;;  %v151_v7 = vld [vmem:[%s593_s1 + $0x18] sm:$0xff]  ;;  %v150_v8 = vld [vmem:[%s593_s1 + $0x10] sm:$0xff]  ;;  %vm156_vm1 = vcmask 523264   ;;  %vm230_vm3 = vcmask 261120   ;;  %p390_p12 = pnand %p389_p11, %p507_p5 }
  0x15   : > { %327 = vmatpush3.msra.mxu0 %v155_v0  ;;  %s310_s28 = sshll.u32 %s136_s25, 3  ;;  %342 = vmatprep.mubr.msk.f32.mxu0 %vm452_vm0, %v451_v2  ;;  %v149_v9 = vld [vmem:[%s593_s1 + $0x8] sm:$0xff]  ;;  %v148_v10 = vld [vmem:[%s593_s1] sm:$0xff]  ;;  %v141_v12 = vand.u32 127, %v140_v11  ;;  %s314_s25 = sshll.u32 %s490_s13, 7 }
  0x16   : > { %328 = vmatprep.subr.mxu0 %v451_v2  ;;  %s138_s3 = scalar_lea.vmem %s592_s0, %s310_s28  ;;  %s551_s30 = scalar_lea.hbm %s594_s2, %s314_s25 }
  0x17   : > { %329 = vmatpush3.msra.mxu0 %v154_v3  ;;  %v139_v6 = vld [vmem:[%s138_s3] sm:$0xff]  ;;  %s233_s3 = scalar_lea.sflag [#allocation3], %s132_s23  ;;  %p391_p13 = pneg %p390_p12 }
  0x18   : > { %330 = vmatprep.subr.mxu0 %v451_v2  ;;  %143 = vperm.xlu0 %387, %v139_v6   ;;  %s453_s13 = smov [#allocation2]  }
  0x19   : > { %331 = vmatpush3.msra.mxu0 %v153_v4  ;;  %s392_s5 = sshll.u32 %s453_s13, 4  ;;  %s393_s5 = int_to_ptr.vmem [resolvable:$false] %s392_s5 }
  0x1a   : > { %332 = vmatprep.subr.mxu0 %v451_v2  ;;  %s394_s6 = scalar_lea.vmem %s393_s5, 256  ;;  %p395_p0 = scmp.lt.s32.totalorder %s553_s27, %s393_s5 }
  0x1b   : > { %333 = vmatpush3.msra.mxu0 %v152_v5  ;;  %p396_p1 = scmp.lt.s32.totalorder %s394_s6, %s388_s4 }
  0x1c   : > { %334 = vmatprep.subr.mxu0 %v451_v2 }
  0x1d   : > { %335 = vmatpush3.msra.mxu0 %v151_v7  ;;  %p397_p2 = por %p396_p1, %p395_p0 }
  0x1e   : > { %336 = vmatprep.subr.mxu0 %v451_v2 }
  0x1f   : > { %337 = vmatpush3.msra.mxu0 %v150_v8  ;;  %p398_p3 = pnand %p397_p2, %p391_p13 }
  0x20   : > { %338 = vmatprep.subr.mxu0 %v451_v2 }
  0x21   : > { %339 = vmatpush3.msra.mxu0 %v149_v9 }
  0x22   : > { %340 = vmatprep.subr.mxu0 %v451_v2 }
  0x23   : > { %341 = vmatpush3.msra.mxu0 %v148_v10 }
  0x93   : > { %v144_v13 = vpop.permute.xlu0 %143 }
  0x94   : > { %vm145_vm2 = vcmp.eq.s32.totalorder %v144_v13, %v141_v12 }
  0x95   : > { %v311_v14 = vsel %vm145_vm2, 1.0, %v451_v2 }
  0x96   : > { %343 = vmatmul.mubr.msk.f32.vlgmr.msra.gmra.mxu0 %vm156_vm1, %v311_v14 }
 0x156   : > { %v226_v15 = vpop.f32.mrf.mxu0 }
 0x157   : > { %231 = vst.msk [vmem:[%s134_s26] sm:$0xff] %vm230_vm3, %v226_v15 }
 0x158   : > { %v344_v16 = vpop.f32.mrf.mxu0 }
 0x159   : > { %401 = shalt.err (!%p398_p3)
}
 0x15a   : > { %s402_s7 = scalar_lea.hbm %s551_s30, 128  ;;  %s406_s16 = scalar_lea.hbm %s594_s2, 256 }
 0x15b   : > { %p403_p4 = scmp.ne.s32.totalorder %s551_s30, %s402_s7  ;;  %p407_p9 = scmp.lt.s32.totalorder %s551_s30, %s594_s2 }
 0x15c   : > { %p408_p10 = scmp.lt.s32.totalorder %s406_s16, %s402_s7 }
 0x15d   : > { %p404_p7 = pnand %p403_p4, %p507_p5 }
 0x15e   : > { %p409_p11 = por %p408_p10, %p407_p9 }
 0x15f   : > { %p405_p8 = pneg %p404_p7 }
 0x161   : > { %p410_p12 = pnand %p409_p11, %p405_p8 }
 0x163   : > { %413 = shalt.err (!%p410_p12)
}
 0x164   : > { %345 = dma.vmem_to_hbm [thread:$0]  (%p507_p5), %s553_s27, 128, %s551_s30, %s233_s3  }
 0x165 PF: > { %p351_p13 = scmp.ge.s32.totalorder %s448_s12, 2  ;;  %s258_s22 = sand.u32 1, %s436_s9  }
 0x166   : > { %s259_s23 = scalar_lea.sflag [#allocation3], %s258_s22 }
 0x167   : > { %p348_p0 = pnand %p351_p13, %p511_p6 }
 0x169   : > { %p349_p1 = pneg %p348_p0 }
 0x16b   : > { %431 = dma.done.wait (%p349_p1), %s259_s23, 128  }
 0x16c   : > { %433 = vsyncadd (%p349_p1), %s259_s23, 4294967168  ;;  %p12_p2 = scmp.ge.s32.totalorder %s494_s15, 4   ;;  %s597_s9 = smov %s440_s10 }
 0x16d   : > { %s598_s10 = smov %s444_s11  ;;  %s599_s11 = smov %s505_s18 }
 0x16e   : > { %s600_s12 = smov %s494_s15  ;;  %14 = sbr.rel (!%p12_p2) target bundleno = 3 (0x3), region = 63 }
 0x173   :  { %264 = vsyncpa [#allocation3], 1 }
 0x174   :  { %266 = vsyncpa [#allocation3 + $0x1], 1 }

</bundles_post_ra>
